<compile_context>
chip_gen: v6e
topology: v6e:2x2x1
jax: 0.10.0
libtpu: 0.0.40
codegen_flags: <defaults>
</compile_context>

<pallas_src>
import jax
import jax.numpy as jnp
from jax.experimental import pallas as pl
from jax.experimental.pallas import tpu as pltpu


def _round_up(x, m):
    return (x + m - 1) // m * m


def _decoder_linker_kernel(x_ref, w_ref, shift_ref, o_ref):
    """One (batch, HW-tile) grid step.

    x_ref:     (1, 9*C2, THW)  im2col patches (tap-major K axis), spatial on lanes
    w_ref:     (Cout, 9*C2)    conv weights with the BN scale pre-folded
    shift_ref: (Cout, 1)       fused BN shift = beta - mean * scale
    o_ref:     (1, Cout, THW)
    """
    acc = jnp.dot(w_ref[...], x_ref[0],
                  preferred_element_type=jnp.float32)            # MXU, (Cout, THW)
    o_ref[0] = jnp.maximum(acc + shift_ref[...], 0.0).astype(o_ref.dtype)


def _pick_hw_tile(hw, c2, cout, itemsize=4, budget_bytes=8 << 20, max_tile=4096):
    """Lane-aligned HW tile: as large as possible within a VMEM byte budget."""
    hw_aligned = _round_up(hw, 128)
    # Dominant per-step VMEM: double-buffered input + output columns.
    per_lane = 2 * (9 * c2 + cout) * itemsize
    cap = max(128, (budget_bytes // per_lane) // 128 * 128)
    return min(hw_aligned, cap, max_tile)


@jax.jit
def decoder_linker_block(dec_x, enc_x, conv_w, bn_gamma, bn_beta,
                         bn_mean, bn_var, eps=1e-5):
    """NCHW in / NCHW out, matching the PyTorch module's forward.

    dec_x, enc_x : (N, Cin, H, W)
    conv_w       : (Cout, 2*Cin, 3, 3)   PyTorch OIHW conv weight
    bn_*         : (Cout,)

    BatchNorm uses eval/inference semantics (running mean/var).
    """
    assert dec_x.shape[1] == enc_x.shape[1]
    N, Cin, H, W = dec_x.shape
    Cout = conv_w.shape[0]
    C2 = 2 * Cin
    HW = H * W

    # --- glue (plain JAX): concat, zero-pad, im2col to (N, 9*C2, H*W) -------
    x = jnp.concatenate([dec_x, enc_x], axis=1)                  # (N, C2, H, W)
    x_pad = jnp.pad(x, ((0, 0), (0, 0), (1, 1), (1, 1)))         # (N, C2, H+2, W+2)
    taps = [x_pad[:, :, kh:kh + H, kw:kw + W]
            for kh in range(3) for kw in range(3)]               # 9 x (N, C2, H, W)
    patches = jnp.stack(taps, axis=1).reshape(N, 9 * C2, HW)
    patches = patches.astype(jnp.float32)
    # TODO(synk): cast patches/weights to bf16 on v6e/v7x once channel counts
    # make the kernel MXU/BW bound (keep the f32 accumulator + f32 epilogue).

    # --- fold BN into the weights / a per-channel shift ----------------------
    scale = bn_gamma / jnp.sqrt(bn_var + eps)                    # (Cout,)
    w2 = jnp.transpose(conv_w, (0, 2, 3, 1)).reshape(Cout, 9 * C2)
    w2 = (w2 * scale[:, None]).astype(jnp.float32)               # scale folded in
    shift = (bn_beta - bn_mean * scale).reshape(Cout, 1).astype(jnp.float32)

    # --- tiling / lane padding / VMEM budgeting ------------------------------
    thw = _pick_hw_tile(HW, C2, Cout)
    n_hw_tiles = pl.cdiv(HW, thw)
    hw_padded = n_hw_tiles * thw
    if hw_padded != HW:                                          # lane-dense pad
        patches = jnp.pad(patches, ((0, 0), (0, 0), (0, hw_padded - HW)))

    in_block = 4 * 9 * C2 * thw
    out_block = 4 * Cout * thw
    w_bytes = 4 * (Cout * 9 * C2 + Cout)
    vmem_bytes = int(min(max(2 * (in_block + out_block) + w_bytes + (2 << 20),
                             16 << 20), 48 << 20))

    cost = pl.CostEstimate(
        flops=2 * N * Cout * 9 * C2 * hw_padded,
        transcendentals=0,
        bytes_accessed=4 * (N * 9 * C2 * hw_padded + N * Cout * hw_padded
                            + Cout * 9 * C2 + Cout))

    # --- hot path: Pallas kernel, grid over (batch, HW tiles) ----------------
    out_flat = pl.pallas_call(
        _decoder_linker_kernel,
        out_shape=jax.ShapeDtypeStruct((N, Cout, hw_padded), jnp.float32),
        grid_spec=pltpu.PrefetchScalarGridSpec(
            num_scalar_prefetch=0,
            grid=(N, n_hw_tiles),
            in_specs=[
                pl.BlockSpec((1, 9 * C2, thw), lambda n, t: (n, 0, t)),
                pl.BlockSpec((Cout, 9 * C2), lambda n, t: (0, 0)),
                pl.BlockSpec((Cout, 1), lambda n, t: (0, 0)),
            ],
            out_specs=pl.BlockSpec((1, Cout, thw), lambda n, t: (n, 0, t)),
        ),
        compiler_params=pltpu.CompilerParams(
            dimension_semantics=("parallel", "parallel"),
            vmem_limit_bytes=vmem_bytes),
        cost_estimate=cost,
    )(patches, w2, shift)

    # Drop the lane padding, then (N, Cout, H*W) -> NCHW (pure reshape).
    return out_flat[:, :, :HW].reshape(N, Cout, H, W)


def _reference(dec_x, enc_x, conv_w, gamma, beta, mean, var, eps=1e-5):
    """Pure-JAX reference (lax conv) for correctness checking."""
    x = jnp.concatenate([dec_x, enc_x], axis=1)                  # NCHW
    y = jax.lax.conv_general_dilated(
        x, conv_w, window_strides=(1, 1), padding=((1, 1), (1, 1)),
        dimension_numbers=("NCHW", "OIHW", "NCHW"))
    scale = gamma / jnp.sqrt(var + eps)
    shift = beta - mean * scale
    y = y * scale[None, :, None, None] + shift[None, :, None, None]
    return jnp.maximum(y, 0.0)


if __name__ == "__main__":
    key = jax.random.PRNGKey(0)
    k1, k2, k3, k4, k5, k6, k7 = jax.random.split(key, 7)

    # Small shapes consistent with the module: in_channels=4, out_channels=8.
    N, Cin, H, W = 2, 4, 16, 16
    Cout = 8

    dec_x = jax.random.normal(k1, (N, Cin, H, W), dtype=jnp.float32)
    enc_x = jax.random.normal(k2, (N, Cin, H, W), dtype=jnp.float32)

    # Deterministic parameter init (synthetic; shapes from __init__).
    conv_w = 0.1 * jax.random.normal(k3, (Cout, 2 * Cin, 3, 3), dtype=jnp.float32)
    bn_gamma = 1.0 + 0.1 * jax.random.normal(k4, (Cout,), dtype=jnp.float32)
    bn_beta = 0.1 * jax.random.normal(k5, (Cout,), dtype=jnp.float32)
    bn_mean = 0.05 * jax.random.normal(k6, (Cout,), dtype=jnp.float32)
    bn_var = jnp.abs(jax.random.normal(k7, (Cout,), dtype=jnp.float32)) + 0.5

    out = decoder_linker_block(dec_x, enc_x, conv_w, bn_gamma, bn_beta,
                               bn_mean, bn_var)
    out = jax.block_until_ready(out)

    ref = _reference(dec_x, enc_x, conv_w, bn_gamma, bn_beta, bn_mean, bn_var)
    assert out.shape == (N, Cout, H, W), out.shape
    assert jnp.allclose(out, ref, atol=1e-4, rtol=1e-4), \
        float(jnp.max(jnp.abs(out - ref)))

    print("KERNEL_OK")
</pallas_src>

<mosaic_0001>
module attributes {stable_mosaic.version = 11 : i64} {
  func.func @_decoder_linker_kernel(%arg0: i32, %arg1: i32, %arg2: memref<1x72x256xf32, #tpu.memory_space<vmem>>, %arg3: memref<8x72xf32, #tpu.memory_space<vmem>>, %arg4: memref<8x1xf32, #tpu.memory_space<vmem>>, %arg5: memref<1x8x256xf32, #tpu.memory_space<vmem>>) attributes {dimension_semantics = [#tpu.dimension_semantics<parallel>, #tpu.dimension_semantics<parallel>], iteration_bounds = array<i64: 2, 1>, scalar_prefetch = 0 : i64, scratch_operands = 0 : i64, tpu.core_type = #tpu.core_type<tc>, window_params = [{transform_indices = @transform_0, window_bounds = array<i64: 1, 72, 256>}, {pipeline_mode = #tpu.pipeline_mode<synchronous>, transform_indices = @transform_1, window_bounds = array<i64: 8, 72>}, {pipeline_mode = #tpu.pipeline_mode<synchronous>, transform_indices = @transform_2, window_bounds = array<i64: 8, 1>}, {transform_indices = @transform_3, window_bounds = array<i64: 1, 8, 256>}]} {
    %c0 = arith.constant 0 : index
    %c0_0 = arith.constant 0 : index
    %0 = vector.load %arg3[%c0, %c0_0] : memref<8x72xf32, #tpu.memory_space<vmem>>, vector<8x72xf32>
    %c0_1 = arith.constant 0 : index
    %c0_2 = arith.constant 0 : index
    %c0_3 = arith.constant 0 : index
    %1 = vector.load %arg2[%c0_1, %c0_2, %c0_3] : memref<1x72x256xf32, #tpu.memory_space<vmem>>, vector<1x72x256xf32>
    %2 = vector.shape_cast %1 : vector<1x72x256xf32> to vector<72x256xf32>
    %cst = arith.constant dense<0.000000e+00> : vector<8x256xf32>
    %3 = tpu.matmul %0, %2, %cst {dimension_numbers = #tpu.dot_dimension_numbers<[1], [0], [0], [1], [0, 0, 1, 1], [], []>} : vector<8x72xf32>, vector<72x256xf32>, vector<8x256xf32> -> vector<8x256xf32>
    %c0_4 = arith.constant 0 : index
    %c0_5 = arith.constant 0 : index
    %4 = vector.load %arg4[%c0_4, %c0_5] : memref<8x1xf32, #tpu.memory_space<vmem>>, vector<8x1xf32>
    %5 = vector.broadcast %4 : vector<8x1xf32> to vector<8x256xf32>
    %6 = arith.addf %3, %5 : vector<8x256xf32>
    %cst_6 = arith.constant 0.000000e+00 : f32
    %7 = vector.broadcast %cst_6 : f32 to vector<8x256xf32>
    %8 = arith.maximumf %6, %7 : vector<8x256xf32>
    %c0_7 = arith.constant 0 : index
    %c0_8 = arith.constant 0 : index
    %c0_9 = arith.constant 0 : index
    %9 = vector.load %arg5[%c0_7, %c0_8, %c0_9] : memref<1x8x256xf32, #tpu.memory_space<vmem>>, vector<1x8x256xf32>
    %10 = vector.shape_cast %9 : vector<1x8x256xf32> to vector<8x256xf32>
    %11 = vector.shape_cast %8 : vector<8x256xf32> to vector<1x8x256xf32>
    tpu.vector_store %arg5[%c0_7, %c0_8, %c0_9], %11 {strides = array<i32>} : memref<1x8x256xf32, #tpu.memory_space<vmem>>, vector<1x8x256xf32>,
    return
  }
  func.func @transform_0(%arg0: i32, %arg1: i32) -> (i32, i32, i32) {
    %c0_i32 = arith.constant 0 : i32
    %c0_i32_0 = arith.constant 0 : i32
    return %arg0, %c0_i32, %arg1 : i32, i32, i32
  }
  func.func @transform_1(%arg0: i32, %arg1: i32) -> (i32, i32) {
    %c0_i32 = arith.constant 0 : i32
    %c0_i32_0 = arith.constant 0 : i32
    %c0_i32_1 = arith.constant 0 : i32
    return %c0_i32, %c0_i32_0 : i32, i32
  }
  func.func @transform_2(%arg0: i32, %arg1: i32) -> (i32, i32) {
    %c0_i32 = arith.constant 0 : i32
    %c0_i32_0 = arith.constant 0 : i32
    %c0_i32_1 = arith.constant 0 : i32
    return %c0_i32, %c0_i32_0 : i32, i32
  }
  func.func @transform_3(%arg0: i32, %arg1: i32) -> (i32, i32, i32) {
    %c0_i32 = arith.constant 0 : i32
    %c0_i32_0 = arith.constant 0 : i32
    return %arg0, %c0_i32, %arg1 : i32, i32, i32
  }
}

</mosaic_0001>

<bundles_post_ra>
// kernel: decoder_linker_block.1
= control target key start
LH: loop header
LB: loop body
LE: loop exit
PB: predicated region body
PF: predicated region fallthrough
CT: control target
= control target key end

     0   :  { %s487_s12 = smov 0   ;;  %s489_s13 = smov 0   ;;  %s550_s0 = inlined_call_operand.vmem [shape: f32[2,72,256], index: 0, kind: input, shape index: {}]   ;;  %s551_s1 = inlined_call_operand.vmem [shape: f32[8,72], index: 1, kind: input, shape index: {}]   ;;  %s552_s2 = inlined_call_operand.vmem [shape: f32[8,1], index: 2, kind: input, shape index: {}]   ;;  %s553_s3 = inlined_call_operand.vmem [shape: f32[2,8,256], index: 3, kind: output, shape index: {}]  }
   0x1   :  { %s491_s14 = smov 0  }
   0x2 LB: > { %s25_s15 = sadd.s32 1, %s459_s13  ;;  %p405_p0 = scmp.ge.s32.totalorder %s463_s14, 1  ;;  %s463_s14 = sphi %s491_s14, %s13_s14   ;;  %s459_s13 = sphi %s489_s13, %s555_s13   ;;  %s455_s12 = sphi %s487_s12, %s554_s12  }
   0x3   : > { %p27_p1 = scmp.ge.s32.totalorder %s25_s15, 2  ;;  %p158_p2 = scmp.lt.s32.totalorder %s463_s14, 3 }
   0x5   : > { %s557_s15 = smov (%p27_p1, %s25_s15), 0  ;;  %p159_p3 = pnand %p405_p0, %p158_p2 }
   0x6   : > { %p191_p4 = scmp.lt.s32.totalorder (!%p159_p3), %s455_s12, 1 }
   0x7   : > { %162 = sbr.rel (%p159_p3) target bundleno = 235 (0xeb), region = 32 }
   0xc   : > { %v229_v0 = vld [vmem:[%s552_s2] sm:$0xff]  ;;  %v465_v1 = vmov 0.0   ;;  %v466_v2 = vmov 0   ;;  %s559_s12 = smov (!%p191_p4, %s455_s12), 1  ;;  %vm235_vm0 = vcmask 588800  }
   0xd   : > { %303 = vmatprep.mubr.f32.mxu0 %v465_v1  ;;  %440 = vset.pattern.permute.xlu0 %v466_v2  ;;  %s413_s18 = smul.u32 144, %s559_s12  ;;  %v210_v21 = vld [vmem:[%s551_s1] sm:$0xff]  ;;  %s412_s24 = sshll.u32 %s559_s12, 4 }
   0xe   : > { %232 = vperm.xlu0 %440, %v229_v0   ;;  %s208_s27 = scalar_lea.vmem %s553_s3, %s412_s24 }
   0xf   : > { %s514_s21 = scalar_lea.vmem %s550_s0, %s413_s18 }
  0x10   : > { %v228_v3 = vld [vmem:[%s514_s21 + $0x88] sm:$0xff]  ;;  %v227_v4 = vld [vmem:[%s514_s21 + $0x80] sm:$0xff]  ;;  %v226_v5 = vld [vmem:[%s514_s21 + $0x78] sm:$0xff] }
  0x11   : > { %253 = vmatprep.subr.mxu0 %v228_v3  ;;  %v225_v6 = vld [vmem:[%s514_s21 + $0x70] sm:$0xff]  ;;  %v224_v7 = vld [vmem:[%s514_s21 + $0x68] sm:$0xff]  ;;  %v223_v8 = vld [vmem:[%s514_s21 + $0x60] sm:$0xff] }
  0x12   : > { %254 = vmatpush1.msra.mxu0 %v227_v4  ;;  %v222_v9 = vld [vmem:[%s514_s21 + $0x58] sm:$0xff]  ;;  %v221_v10 = vld [vmem:[%s514_s21 + $0x50] sm:$0xff]  ;;  %v220_v11 = vld [vmem:[%s514_s21 + $0x48] sm:$0xff] }
  0x13   : > { %255 = vmatprep.subr.mxu0 %v226_v5  ;;  %v219_v12 = vld [vmem:[%s514_s21 + $0x40] sm:$0xff]  ;;  %v218_v13 = vld [vmem:[%s514_s21 + $0x38] sm:$0xff]  ;;  %v217_v14 = vld [vmem:[%s514_s21 + $0x30] sm:$0xff] }
  0x14   : > { %256 = vmatpush1.msra.mxu0 %v225_v6  ;;  %v216_v15 = vld [vmem:[%s514_s21 + $0x28] sm:$0xff]  ;;  %v215_v16 = vld [vmem:[%s514_s21 + $0x20] sm:$0xff]  ;;  %v214_v17 = vld [vmem:[%s514_s21 + $0x18] sm:$0xff] }
  0x15   : > { %257 = vmatprep.subr.mxu0 %v224_v7  ;;  %v213_v18 = vld [vmem:[%s514_s21 + $0x10] sm:$0xff]  ;;  %v212_v19 = vld [vmem:[%s514_s21 + $0x8] sm:$0xff]  ;;  %v211_v20 = vld [vmem:[%s514_s21] sm:$0xff] }
  0x16   : > { %258 = vmatpush1.msra.mxu0 %v223_v8 }
  0x17   : > { %259 = vmatprep.subr.mxu0 %v222_v9 }
  0x18   : > { %260 = vmatpush1.msra.mxu0 %v221_v10 }
  0x19   : > { %261 = vmatprep.subr.mxu0 %v220_v11 }
  0x1a   : > { %262 = vmatpush1.msra.mxu0 %v219_v12 }
  0x1b   : > { %263 = vmatprep.subr.mxu0 %v218_v13 }
  0x1c   : > { %264 = vmatpush1.msra.mxu0 %v217_v14 }
  0x1d   : > { %265 = vmatprep.subr.mxu0 %v216_v15 }
  0x1e   : > { %266 = vmatpush1.msra.mxu0 %v215_v16 }
  0x1f   : > { %267 = vmatprep.subr.mxu0 %v214_v17 }
  0x20   : > { %268 = vmatpush1.msra.mxu0 %v213_v18 }
  0x21   : > { %269 = vmatprep.subr.mxu0 %v212_v19 }
  0x22   : > { %270 = vmatpush1.msra.mxu0 %v211_v20 }
  0x23   : > { %409 = vmatmul.mubr.msk.f32.vlgmr.msra.gmra.mxu0 %vm235_vm0, %v210_v21 }
  0x89   : > { %v233_v22 = vpop.permute.xlu0 %232 }
  0xe3   : > { %v305_v23 = vpop.f32.mrf.mxu0 }
  0xe4   : > { %v306_v24 = vadd.f32 %v305_v23, %v233_v22 }
  0xe5   : > { %v307_v25 = vpop.f32.mrf.mxu0 }
  0xe6   : > { %v310_v26 = vmax.f32 %v306_v24, 0.0  ;;  %v308_v27 = vadd.f32 %v307_v25, %v233_v22 }
  0xe8   : > { %312 = vst [vmem:[%s208_s27] sm:$0xff] %v310_v26  ;;  %v311_v28 = vmax.f32 %v308_v27, 0.0 }
  0xea   : > { %313 = vst [vmem:[%s208_s27 + $0x8] sm:$0xff] %v311_v28 }
  0xeb PF: > { %s13_s14 = sadd.s32 1, %s463_s14   ;;  %s554_s12 = smov %s459_s13 }
  0xec   : > { %p10_p5 = scmp.ge.s32.totalorder %s13_s14, 4   ;;  %s555_s13 = smov %s557_s15 }
  0xee   :  { %12 = sbr.rel (!%p10_p5) target bundleno = 2 (0x2), region = 62 }

</bundles_post_ra>
